<compile_context>
chip_gen: v6e
topology: v6e:2x2x1
jax: 0.10.0
libtpu: 0.0.40
codegen_flags: <defaults>
</compile_context>

<pallas_src>
import jax
import jax.numpy as jnp
from jax.experimental import pallas as pl
from jax.experimental.pallas import tpu as pltpu

LANE = 128          # vreg lane width
COMPUTE_DTYPE = jnp.bfloat16


def _round_up(v, m):
    return ((v + m - 1) // m) * m


def _m_tiling(M):
    # Rows: multiple of 8 sublanes; 128-row tiles once the batch is big enough.
    if M >= 128:
        tm = 128
        return _round_up(M, tm), tm
    tm = _round_up(M, 8)
    return tm, tm


def _k_tiling(K):
    # Contraction: lane-aligned, capped at 512 so double-buffered input tiles
    # stay well inside v7x's 64 MiB physical / 32 MiB scoped VMEM.
    tk = min(512, _round_up(K, LANE))
    return _round_up(K, tk), tk


def _n_tiling(N):
    # Output lanes: pad Out to a 128 multiple (unmasked stores); prefer
    # 256-wide tiles when possible to match the v6e/v7x 256-wide MXU.
    n_pad = _round_up(N, LANE)
    tn = 256 if n_pad % 256 == 0 else 128
    return n_pad, tn


def linear_kernel(x_ref, w_ref, b_ref, o_ref, acc_ref):
    # x_ref: (tm, tk) f32   w_ref: (tk, tn) bf16   b_ref: (1, tn) f32
    # o_ref: (tm, tn) f32   acc_ref: (tm, tn) f32 scratch (K-resident)
    k = pl.program_id(2)

    @pl.when(k == 0)
    def _init():
        # Seed accumulator with the bias -> no separate bias-add epilogue.
        acc_ref[...] = jnp.broadcast_to(b_ref[...], acc_ref.shape)

    acc_ref[...] += jnp.dot(
        x_ref[...].astype(COMPUTE_DTYPE),     # bf16 MXU inputs
        w_ref[...],                           # already bf16 from prep
        preferred_element_type=jnp.float32,   # f32 accumulation
    )

    @pl.when(k == pl.num_programs(2) - 1)
    def _writeback():
        o_ref[...] = acc_ref[...].astype(o_ref.dtype)


def prepare_params(weight, bias):
    """One-time parameter prep (done at creation time, not per forward call).

    weight: (Out, In) f32 (PyTorch nn.Linear layout)
    bias:   (Out,)    f32
    Returns w_p: (K_pad, N_pad) bf16, b_p: (1, N_pad) f32.
    """
    out_features, in_features = weight.shape
    k_pad, _ = _k_tiling(in_features)
    n_pad, _ = _n_tiling(out_features)

    w_t = jnp.transpose(weight).astype(COMPUTE_DTYPE)            # (In, Out), once
    w_p = jnp.pad(w_t, ((0, k_pad - in_features), (0, n_pad - out_features)))
    b_p = jnp.pad(bias.astype(jnp.float32), (0, n_pad - out_features))
    return w_p, b_p.reshape(1, n_pad)


def linear_forward(x, w_prepped, b_prepped, out_features):
    """x: (B, In) f32; w_prepped/b_prepped from prepare_params."""
    M, K = x.shape
    m_pad, tm = _m_tiling(M)
    k_pad, tk = _k_tiling(K)
    n_pad, tn = _n_tiling(out_features)
    assert w_prepped.shape == (k_pad, n_pad)
    assert b_prepped.shape == (1, n_pad)

    if (m_pad, k_pad) != (M, K):
        x = jnp.pad(x, ((0, m_pad - M), (0, k_pad - K)))

    grid = (m_pad // tm, n_pad // tn, k_pad // tk)

    out_padded = pl.pallas_call(
        linear_kernel,
        out_shape=jax.ShapeDtypeStruct((m_pad, n_pad), jnp.float32),
        grid_spec=pltpu.PrefetchScalarGridSpec(
            num_scalar_prefetch=0,
            grid=grid,
            in_specs=[
                pl.BlockSpec((tm, tk), lambda i, j, k: (i, k)),   # x tile
                pl.BlockSpec((tk, tn), lambda i, j, k: (k, j)),   # weight tile
                pl.BlockSpec((1, tn), lambda i, j, k: (0, j)),    # bias tile
            ],
            out_specs=pl.BlockSpec((tm, tn), lambda i, j, k: (i, j)),
            scratch_shapes=[pltpu.VMEM((tm, tn), jnp.float32)],
        ),
        compiler_params=pltpu.CompilerParams(
            dimension_semantics=("parallel", "parallel", "arbitrary"),
            vmem_limit_bytes=32 * 1024 * 1024,   # safe on v5e/v6e/v7x
        ),
    )(x, w_prepped, b_prepped)

    return out_padded[:M, :out_features]


if __name__ == "__main__":
    # Small shapes consistent with nn.Linear(input_size, output_size).
    # NOTE: at this toy size the call is overhead-bound; the tiling/padding
    # machinery is what makes the same kernel scale to MXU-sized shapes.
    batch, input_size, output_size = 8, 32, 16

    key = jax.random.PRNGKey(0)
    kx, kw, kb = jax.random.split(key, 3)

    # Parameter init mimicking torch.nn.Linear default: U(-1/sqrt(in), 1/sqrt(in))
    bound = 1.0 / (input_size ** 0.5)
    weight = jax.random.uniform(kw, (output_size, input_size),
                                minval=-bound, maxval=bound, dtype=jnp.float32)
    bias = jax.random.uniform(kb, (output_size,),
                              minval=-bound, maxval=bound, dtype=jnp.float32)
    x = jax.random.normal(kx, (batch, input_size), dtype=jnp.float32)

    # One-time parameter prep (transpose + bf16 cast + lane padding).
    w_p, b_p = prepare_params(weight, bias)

    out = linear_forward(x, w_p, b_p, output_size)
    out = jax.block_until_ready(out)

    # Pure-JAX f32 reference; tolerance loosened for bf16 MXU inputs.
    ref = x @ weight.T + bias
    assert out.shape == (batch, output_size)
    assert jnp.allclose(out, ref, atol=2e-2, rtol=2e-2), \
        float(jnp.max(jnp.abs(out - ref)))

    print("KERNEL_OK")
</pallas_src>

<mosaic_0001>
module attributes {stable_mosaic.version = 11 : i64} {
  func.func @linear_kernel(%arg0: i32, %arg1: i32, %arg2: i32, %arg3: memref<8x128xf32, #tpu.memory_space<vmem>>, %arg4: memref<128x128xbf16, #tpu.memory_space<vmem>>, %arg5: memref<1x128xf32, #tpu.memory_space<vmem>>, %arg6: memref<8x128xf32, #tpu.memory_space<vmem>>, %arg7: memref<8x128xf32, #tpu.memory_space<vmem>>) attributes {dimension_semantics = [#tpu.dimension_semantics<parallel>, #tpu.dimension_semantics<parallel>, #tpu.dimension_semantics<arbitrary>], iteration_bounds = array<i64: 1, 1, 1>, scalar_prefetch = 0 : i64, scratch_operands = 1 : i64, tpu.core_type = #tpu.core_type<tc>, window_params = [{transform_indices = @transform_0, window_bounds = array<i64: 8, 128>}, {transform_indices = @transform_1, window_bounds = array<i64: 128, 128>}, {transform_indices = @transform_2, window_bounds = array<i64: 1, 128>}, {transform_indices = @transform_3, window_bounds = array<i64: 8, 128>}]} {
    %c0_i32 = arith.constant 0 : i32
    %0 = arith.cmpi eq, %arg2, %c0_i32 : i32
    %1 = arith.extui %0 : i1 to i32
    %c0_i32_0 = arith.constant 0 : i32
    %2 = arith.cmpi ne, %1, %c0_i32_0 : i32
    scf.if %2 {
      %c0_10 = arith.constant 0 : index
      %c0_11 = arith.constant 0 : index
      %13 = vector.load %arg5[%c0_10, %c0_11] : memref<1x128xf32, #tpu.memory_space<vmem>>, vector<1x128xf32>
      %14 = vector.shape_cast %13 : vector<1x128xf32> to vector<1x128xf32>
      %15 = vector.broadcast %14 : vector<1x128xf32> to vector<8x128xf32>
      %c0_12 = arith.constant 0 : index
      %c0_13 = arith.constant 0 : index
      %16 = vector.load %arg7[%c0_12, %c0_13] : memref<8x128xf32, #tpu.memory_space<vmem>>, vector<8x128xf32>
      tpu.vector_store %arg7[%c0_12, %c0_13], %15 {strides = array<i32>} : memref<8x128xf32, #tpu.memory_space<vmem>>, vector<8x128xf32>,
    } else {
    }
    %c0 = arith.constant 0 : index
    %c0_1 = arith.constant 0 : index
    %3 = vector.load %arg7[%c0, %c0_1] : memref<8x128xf32, #tpu.memory_space<vmem>>, vector<8x128xf32>
    %c0_2 = arith.constant 0 : index
    %c0_3 = arith.constant 0 : index
    %4 = vector.load %arg3[%c0_2, %c0_3] : memref<8x128xf32, #tpu.memory_space<vmem>>, vector<8x128xf32>
    %5 = arith.truncf %4 : vector<8x128xf32> to vector<8x128xbf16>
    %c0_4 = arith.constant 0 : index
    %c0_5 = arith.constant 0 : index
    %6 = vector.load %arg4[%c0_4, %c0_5] : memref<128x128xbf16, #tpu.memory_space<vmem>>, vector<128x128xbf16>
    %cst = arith.constant dense<0.000000e+00> : vector<8x128xf32>
    %7 = tpu.matmul %5, %6, %cst {dimension_numbers = #tpu.dot_dimension_numbers<[1], [0], [0], [1], [0, 0, 1, 1], [], []>} : vector<8x128xbf16>, vector<128x128xbf16>, vector<8x128xf32> -> vector<8x128xf32>
    %8 = arith.addf %3, %7 : vector<8x128xf32>
    %c0_6 = arith.constant 0 : index
    %c0_7 = arith.constant 0 : index
    %9 = vector.load %arg7[%c0_6, %c0_7] : memref<8x128xf32, #tpu.memory_space<vmem>>, vector<8x128xf32>
    tpu.vector_store %arg7[%c0_6, %c0_7], %8 {strides = array<i32>} : memref<8x128xf32, #tpu.memory_space<vmem>>, vector<8x128xf32>,
    %c0_i32_8 = arith.constant 0 : i32
    %10 = arith.cmpi eq, %arg2, %c0_i32_8 : i32
    %11 = arith.extui %10 : i1 to i32
    %c0_i32_9 = arith.constant 0 : i32
    %12 = arith.cmpi ne, %11, %c0_i32_9 : i32
    scf.if %12 {
      %c0_10 = arith.constant 0 : index
      %c0_11 = arith.constant 0 : index
      %13 = vector.load %arg7[%c0_10, %c0_11] : memref<8x128xf32, #tpu.memory_space<vmem>>, vector<8x128xf32>
      %c0_12 = arith.constant 0 : index
      %c0_13 = arith.constant 0 : index
      %14 = vector.load %arg6[%c0_12, %c0_13] : memref<8x128xf32, #tpu.memory_space<vmem>>, vector<8x128xf32>
      tpu.vector_store %arg6[%c0_12, %c0_13], %13 {strides = array<i32>} : memref<8x128xf32, #tpu.memory_space<vmem>>, vector<8x128xf32>,
    } else {
    }
    return
  }
  func.func @transform_0(%arg0: i32, %arg1: i32, %arg2: i32) -> (i32, i32) {
    %c0_i32 = arith.constant 0 : i32
    return %arg0, %arg2 : i32, i32
  }
  func.func @transform_1(%arg0: i32, %arg1: i32, %arg2: i32) -> (i32, i32) {
    %c0_i32 = arith.constant 0 : i32
    return %arg2, %arg1 : i32, i32
  }
  func.func @transform_2(%arg0: i32, %arg1: i32, %arg2: i32) -> (i32, i32) {
    %c0_i32 = arith.constant 0 : i32
    %c0_i32_0 = arith.constant 0 : i32
    return %c0_i32, %arg1 : i32, i32
  }
  func.func @transform_3(%arg0: i32, %arg1: i32, %arg2: i32) -> (i32, i32) {
    %c0_i32 = arith.constant 0 : i32
    return %arg0, %arg1 : i32, i32
  }
}

</mosaic_0001>

<bundles_post_ra>
// kernel: tpu_custom_call.1
= control target key start
LH: loop header
LB: loop body
LE: loop exit
PB: predicated region body
PF: predicated region fallthrough
CT: control target
= control target key end

     0   :  { %8 = vsyncpa [#allocation4], 0  ;;  %s342_s0 = inlined_call_operand.hbm [shape: f32[8,128], index: 0, kind: input, shape index: {}]   ;;  %s343_s1 = inlined_call_operand.hbm [shape: bf16[128,128], index: 1, kind: input, shape index: {}]   ;;  %s344_s2 = inlined_call_operand.vmem [shape: f32[1,128], index: 2, kind: input, shape index: {}]   ;;  %s345_s3 = inlined_call_operand.hbm [shape: f32[8,128], index: 3, kind: output, shape index: {}]  }
   0x1   :  { %9 = vsyncpa [#allocation7], 0 }
   0x2   :  { %10 = vsyncpa [#allocation5], 0  ;;  %s303_s12 = smov [#allocation3]   ;;  %s304_s14 = smov [#allocation6]  }
   0x3   :  { %s17_s13 = sshll.u32 %s303_s12, 4  ;;  %s26_s15 = sshll.u32 %s304_s14, 4  ;;  %s18_s13 = int_to_ptr.vmem [resolvable:$true] %s17_s13  ;;  %s27_s15 = int_to_ptr.vmem [resolvable:$true] %s26_s15 }
   0x4   :  { %s245_s16 = scalar_lea.vmem %s18_s13, 128  ;;  %p250_p1 = scmp.lt.s32.totalorder %s18_s13, %s18_s13 }
   0x5   :  { %p246_p0 = scmp.ne.s32.totalorder %s18_s13, %s245_s16  ;;  %p251_p2 = scmp.lt.s32.totalorder %s245_s16, %s245_s16 }
   0x7   :  { %p252_p3 = por %p251_p2, %p250_p1 }
   0x9   :  { %p253_p4 = pnand %p252_p3, %p246_p0 }
   0xb   :  { %256 = shalt.err (!%p253_p4)
}
   0xc   :  { %20 = dma.hbm_to_vmem [thread:$0]  %s342_s0, 128, %s18_s13, [#allocation4]  }
   0xd   :  { %s265_s19 = scalar_lea.vmem %s27_s15, 1024  ;;  %p270_p6 = scmp.lt.s32.totalorder %s27_s15, %s27_s15 }
   0xe   :  { %p266_p5 = scmp.ne.s32.totalorder %s27_s15, %s265_s19  ;;  %p271_p7 = scmp.lt.s32.totalorder %s265_s19, %s265_s19 }
  0x10   :  { %p272_p8 = por %p271_p7, %p270_p6 }
  0x12   :  { %p273_p9 = pnand %p272_p8, %p266_p5 }
  0x14   :  { %276 = shalt.err (!%p273_p9)
}
  0x15   :  { %s305_s20 = smov 64   ;;  %s306_s21 = smov 4  }
  0x16   :  { %32 = dma.hbm_to_vmem [thread:$0]  %s343_s1, 1024, %s27_s15, [#allocation7], %s305_s20, %s305_s20, %s306_s21  }
  0x17   :  { %297 = dma.done.wait [#allocation4], 128  }
  0x18   :  { %298 = vsyncadd [#allocation4], 4294967168 }
  0x19   :  { %299 = dma.done.wait [#allocation7], 1024  }
  0x1a   :  { %300 = vsyncadd [#allocation7], 4294966272  ;;  %v307_v0 = vmov 0.0   ;;  %vm308_vm0 = vmmov 0   ;;  %v229_v1 = vld [vmem:[#allocation6 + $0x38] sm:$0xff]   ;;  %v230_v2 = vld [vmem:[#allocation6 + $0x30] sm:$0xff]  }
  0x1b   :  { %202 = vmatprep.subr.bf16.mxu0 %v307_v0  ;;  %218 = vmatprep.mubr.msk.bf16.mxu0 %vm308_vm0, %v307_v0  ;;  %v231_v3 = vld [vmem:[#allocation6 + $0x28] sm:$0xff]   ;;  %v232_v4 = vld [vmem:[#allocation6 + $0x20] sm:$0xff]   ;;  %v233_v5 = vld [vmem:[#allocation6 + $0x18] sm:$0xff]   ;;  %s309_s24 = smov [#allocation8]  }
  0x1c   :  { %203 = vmatpush3.bf16.msra.mxu0 %v229_v1  ;;  %v234_v6 = vld [vmem:[#allocation6 + $0x10] sm:$0xff]   ;;  %v235_v7 = vld [vmem:[#allocation6 + $0x8] sm:$0xff]   ;;  %v236_v8 = vld [vmem:[#allocation6] sm:$0xff]   ;;  %s174_s25 = sshll.u32 %s309_s24, 4  ;;  %s175_s25 = int_to_ptr.vmem [resolvable:$true] %s174_s25 }
  0x1d   :  { %204 = vmatprep.subr.bf16.mxu0 %v307_v0  ;;  %v55_v9 = vld [vmem:[#allocation3] sm:$0xff]  ;;  %s277_s26 = scalar_lea.vmem %s175_s25, 128  ;;  %p282_p11 = scmp.lt.s32.totalorder %s175_s25, %s175_s25 }
  0x1e   :  { %v56_v10 = vpack.c.bf16 %v55_v9, %v55_v9  ;;  %v184_v11 = vld [vmem:[%s344_s2] ss:$0 sm:$0xff]  ;;  %p278_p10 = scmp.ne.s32.totalorder %s175_s25, %s277_s26  ;;  %p283_p12 = scmp.lt.s32.totalorder %s277_s26, %s277_s26 }
  0x20   :  { %205 = vmatpush3.bf16.msra.mxu0 %v230_v2  ;;  %p284_p13 = por %p283_p12, %p282_p11 }
  0x21   :  { %206 = vmatprep.subr.bf16.mxu0 %v307_v0 }
  0x22   :  { %p285_p0 = pnand %p284_p13, %p278_p10 }
  0x24   :  { %207 = vmatpush3.bf16.msra.mxu0 %v231_v3 }
  0x25   :  { %208 = vmatprep.subr.bf16.mxu0 %v307_v0 }
  0x28   :  { %209 = vmatpush3.bf16.msra.mxu0 %v232_v4 }
  0x29   :  { %210 = vmatprep.subr.bf16.mxu0 %v307_v0 }
  0x2c   :  { %211 = vmatpush3.bf16.msra.mxu0 %v233_v5 }
  0x2d   :  { %212 = vmatprep.subr.bf16.mxu0 %v307_v0 }
  0x30   :  { %213 = vmatpush3.bf16.msra.mxu0 %v234_v6 }
  0x31   :  { %214 = vmatprep.subr.bf16.mxu0 %v307_v0 }
  0x34   :  { %215 = vmatpush3.bf16.msra.mxu0 %v235_v7 }
  0x35   :  { %216 = vmatprep.subr.bf16.mxu0 %v307_v0 }
  0x38   :  { %217 = vmatpush3.bf16.msra.mxu0 %v236_v8 }
  0x3b   :  { %219 = vmatmul.mubr.bf16.vlgmr.msra.gmra.mxu0 %v56_v10 }
  0xfb   :  { %v155_v12 = vpop.f32.mrf.mxu0 }
  0xfc   :  { %v161_v13 = vadd.f32 %v184_v11, %v155_v12 }
  0xfd   :  { %v220_v14 = vpop.f32.mrf.mxu0 }
  0xfe   :  { %167 = vst [vmem:[#allocation8] sm:$0xff] %v161_v13 }
  0xff   :  { %v158_v15 = vpop.f32.mrf.mxu0 }
 0x100   :  { %288 = shalt.err (!%p285_p0)
}
 0x101   :  { %177 = dma.vmem_to_hbm [thread:$0]  %s175_s25, 128, %s345_s3, [#allocation5]   ;;  %v221_v16 = vpop.f32.mrf.mxu0 }
 0x102   :  { %301 = dma.done.wait [#allocation5], 128  }
 0x103   :  { %302 = vsyncadd [#allocation5], 4294967168 }
 0x104   :  { %181 = vsyncpa [#allocation4], 1 }
 0x105   :  { %182 = vsyncpa [#allocation7], 1 }
 0x106   :  { %183 = vsyncpa [#allocation5], 1 }

</bundles_post_ra>
